<compile_context>
chip_gen: v7x
topology: tpu7x:2x2x1
jax: 0.10.0
libtpu: 0.0.40
codegen_flags: <defaults>
</compile_context>

<pallas_src>
import jax
import jax.numpy as jnp
from jax.experimental import pallas as pl
from jax.experimental.pallas import tpu as pltpu

_HIGHEST = jax.lax.Precision.HIGHEST


def se1d_kernel(x_ref, pool_ref, w1t_ref, b1_ref, w2t_ref, b2_ref, exp_ref, o_ref):
    x = x_ref[...]                                                     # (Nb, D) f32
    # --- squeeze: adaptive avg pool over L, as a matmul with the (D, C) pooling matrix ---
    pooled = jnp.dot(x, pool_ref[...], precision=_HIGHEST,
                     preferred_element_type=jnp.float32)               # (Nb, C)
    # --- excitation: fc1 -> ReLU -> fc2 -> Sigmoid, batched over the whole block ---
    h = jnp.dot(pooled, w1t_ref[...], precision=_HIGHEST,
                preferred_element_type=jnp.float32) + b1_ref[...]      # (Nb, S)
    h = jnp.maximum(h, 0.0)
    s = jnp.dot(h, w2t_ref[...], precision=_HIGHEST,
                preferred_element_type=jnp.float32) + b2_ref[...]      # (Nb, C)
    s = jax.nn.sigmoid(s)                                              # scale_activation
    # --- broadcast scale over L (lane-dense) via the (C, D) expand matrix, then scale x ---
    scale = jnp.dot(s, exp_ref[...], precision=_HIGHEST,
                    preferred_element_type=jnp.float32)                # (Nb, D)
    o_ref[...] = (scale * x).astype(o_ref.dtype)


def _pick_block_n(n, d, itemsize, target_bytes=2 << 20):
    # ~2 MiB per x block; with in+out double-buffering that's ~8 MiB of VMEM,
    # which fits the scoped default on v5e/v6e/v7x with ample headroom.
    bn = max(1, target_bytes // (d * itemsize))
    if bn >= n:
        return n
    return max(8, (bn // 8) * 8)   # keep second-to-last block dim a multiple of 8


def squeeze_excitation_1d(x, w1, b1, w2, b2, *, block_n=None):
    """Forward of SqueezeExcitation1d (setype='avg', scale_activation=nn.Sigmoid).

    x: (N, C, L); w1: (S, C) fc1.weight; b1: (S,) fc1.bias;
    w2: (C, S) fc2.weight; b2: (C,) fc2.bias.
    """
    N, C, L = x.shape
    S = w1.shape[0]
    D = C * L
    if block_n is None:
        block_n = _pick_block_n(N, D, x.dtype.itemsize)
    grid = (pl.cdiv(N, block_n),)

    x2 = x.reshape(N, D)                                    # lane-dense layout
    eye = jnp.eye(C, dtype=x.dtype)
    pool_mat = jnp.repeat(eye, L, axis=0) / jnp.asarray(L, x.dtype)   # (D, C): avg pool
    expand_mat = jnp.repeat(eye, L, axis=1)                            # (C, D): broadcast over L
    w1t = w1.T                                              # (C, S)
    w2t = w2.T                                              # (S, C)
    b1r = b1.reshape(1, S)                                  # lane-dense bias
    b2r = b2.reshape(1, C)

    const = lambda *_: (0, 0)                               # weights stay resident
    out2 = pl.pallas_call(
        se1d_kernel,
        out_shape=jax.ShapeDtypeStruct((N, D), x.dtype),
        grid_spec=pltpu.PrefetchScalarGridSpec(
            num_scalar_prefetch=0,
            grid=grid,
            in_specs=[
                pl.BlockSpec((block_n, D), lambda n: (n, 0)),   # x tile (Nb rows)
                pl.BlockSpec((D, C), const),                    # pooling matrix
                pl.BlockSpec((C, S), const),                    # fc1 weight (pre-transposed)
                pl.BlockSpec((1, S), const),                    # fc1 bias (lane-dense)
                pl.BlockSpec((S, C), const),                    # fc2 weight (pre-transposed)
                pl.BlockSpec((1, C), const),                    # fc2 bias (lane-dense)
                pl.BlockSpec((C, D), const),                    # expand matrix
            ],
            out_specs=pl.BlockSpec((block_n, D), lambda n: (n, 0)),
        ),
        compiler_params=pltpu.CompilerParams(
            dimension_semantics=("parallel",),
            vmem_limit_bytes=48 * 1024 * 1024,   # safe on v7x's 64 MiB VMEM, plenty on v5e/v6e
        ),
    )(x2, pool_mat, w1t, b1r, w2t, b2r, expand_mat)
    return out2.reshape(N, C, L)


def reference(x, w1, b1, w2, b2):
    pooled = jnp.mean(x, axis=-1)                                            # (N, C)
    h = jnp.maximum(jnp.dot(pooled, w1.T, precision=_HIGHEST) + b1, 0.0)     # (N, S)
    s = jax.nn.sigmoid(jnp.dot(h, w2.T, precision=_HIGHEST) + b2)            # (N, C)
    return s[:, :, None] * x


if __name__ == "__main__":
    N, C, L = 32, 16, 16          # batch, input_channels, length
    S = 8                         # squeeze_channels

    key = jax.random.PRNGKey(0)
    kx, k1, k2, k3, k4 = jax.random.split(key, 5)

    x = jax.random.normal(kx, (N, C, L), dtype=jnp.float32)

    # Deterministic "PyTorch-like" Linear init: U(-1/sqrt(fan_in), 1/sqrt(fan_in))
    bound1 = 1.0 / (C ** 0.5)
    w1 = jax.random.uniform(k1, (S, C), jnp.float32, -bound1, bound1)   # fc1.weight
    b1 = jax.random.uniform(k2, (S,), jnp.float32, -bound1, bound1)     # fc1.bias
    bound2 = 1.0 / (S ** 0.5)
    w2 = jax.random.uniform(k3, (C, S), jnp.float32, -bound2, bound2)   # fc2.weight
    b2 = jax.random.uniform(k4, (C,), jnp.float32, -bound2, bound2)     # fc2.bias

    # block_n=8 -> grid of 4 batched steps (exercises pipelining + parallel batch axis)
    out = squeeze_excitation_1d(x, w1, b1, w2, b2, block_n=8)
    out = jax.block_until_ready(out)

    ref = reference(x, w1, b1, w2, b2)
    assert out.shape == x.shape and out.dtype == x.dtype
    assert jnp.allclose(out, ref, atol=1e-4, rtol=1e-4), "mismatch vs reference"

    # TODO(synk): setype='max' (AdaptiveMaxPool1d) variant needs a non-matmul pooling path.
    # TODO(synk): accept bf16 x in/out (halve HBM traffic) once the surrounding model supplies bf16.
    print("KERNEL_OK")
</pallas_src>

<mosaic_0001>
module attributes {stable_mosaic.version = 11 : i64} {
  func.func @se1d_kernel(%arg0: i32, %arg1: memref<8x256xf32, #tpu.memory_space<vmem>>, %arg2: memref<256x16xf32, #tpu.memory_space<vmem>>, %arg3: memref<16x8xf32, #tpu.memory_space<vmem>>, %arg4: memref<1x8xf32, #tpu.memory_space<vmem>>, %arg5: memref<8x16xf32, #tpu.memory_space<vmem>>, %arg6: memref<1x16xf32, #tpu.memory_space<vmem>>, %arg7: memref<16x256xf32, #tpu.memory_space<vmem>>, %arg8: memref<8x256xf32, #tpu.memory_space<vmem>>) attributes {dimension_semantics = [#tpu.dimension_semantics<parallel>], iteration_bounds = array<i64: 4>, scalar_prefetch = 0 : i64, scratch_operands = 0 : i64, tpu.core_type = #tpu.core_type<tc>, window_params = [{transform_indices = @transform_0, window_bounds = array<i64: 8, 256>}, {pipeline_mode = #tpu.pipeline_mode<synchronous>, transform_indices = @transform_1, window_bounds = array<i64: 256, 16>}, {pipeline_mode = #tpu.pipeline_mode<synchronous>, transform_indices = @transform_2, window_bounds = array<i64: 16, 8>}, {pipeline_mode = #tpu.pipeline_mode<synchronous>, transform_indices = @transform_3, window_bounds = array<i64: 1, 8>}, {pipeline_mode = #tpu.pipeline_mode<synchronous>, transform_indices = @transform_4, window_bounds = array<i64: 8, 16>}, {pipeline_mode = #tpu.pipeline_mode<synchronous>, transform_indices = @transform_5, window_bounds = array<i64: 1, 16>}, {pipeline_mode = #tpu.pipeline_mode<synchronous>, transform_indices = @transform_6, window_bounds = array<i64: 16, 256>}, {transform_indices = @transform_7, window_bounds = array<i64: 8, 256>}]} {
    %c0 = arith.constant 0 : index
    %c0_0 = arith.constant 0 : index
    %0 = vector.load %arg1[%c0, %c0_0] : memref<8x256xf32, #tpu.memory_space<vmem>>, vector<8x256xf32>
    %c0_1 = arith.constant 0 : index
    %c0_2 = arith.constant 0 : index
    %1 = vector.load %arg2[%c0_1, %c0_2] : memref<256x16xf32, #tpu.memory_space<vmem>>, vector<256x16xf32>
    %cst = arith.constant dense<0.000000e+00> : vector<8x16xf32>
    %2 = tpu.matmul %0, %1, %cst {dimension_numbers = #tpu.dot_dimension_numbers<[1], [0], [0], [1], [0, 0, 1, 1], [], []>, precision = #tpu.contract_precision<fp32>} : vector<8x256xf32>, vector<256x16xf32>, vector<8x16xf32> -> vector<8x16xf32>
    %c0_3 = arith.constant 0 : index
    %c0_4 = arith.constant 0 : index
    %3 = vector.load %arg3[%c0_3, %c0_4] : memref<16x8xf32, #tpu.memory_space<vmem>>, vector<16x8xf32>
    %cst_5 = arith.constant dense<0.000000e+00> : vector<8x8xf32>
    %4 = tpu.matmul %2, %3, %cst_5 {dimension_numbers = #tpu.dot_dimension_numbers<[1], [0], [0], [1], [0, 0, 1, 1], [], []>, precision = #tpu.contract_precision<fp32>} : vector<8x16xf32>, vector<16x8xf32>, vector<8x8xf32> -> vector<8x8xf32>
    %c0_6 = arith.constant 0 : index
    %c0_7 = arith.constant 0 : index
    %5 = vector.load %arg4[%c0_6, %c0_7] : memref<1x8xf32, #tpu.memory_space<vmem>>, vector<1x8xf32>
    %6 = vector.broadcast %5 : vector<1x8xf32> to vector<8x8xf32>
    %7 = arith.addf %4, %6 : vector<8x8xf32>
    %cst_8 = arith.constant 0.000000e+00 : f32
    %8 = vector.broadcast %cst_8 : f32 to vector<8x8xf32>
    %9 = arith.maximumf %7, %8 : vector<8x8xf32>
    %c0_9 = arith.constant 0 : index
    %c0_10 = arith.constant 0 : index
    %10 = vector.load %arg5[%c0_9, %c0_10] : memref<8x16xf32, #tpu.memory_space<vmem>>, vector<8x16xf32>
    %cst_11 = arith.constant dense<0.000000e+00> : vector<8x16xf32>
    %11 = tpu.matmul %9, %10, %cst_11 {dimension_numbers = #tpu.dot_dimension_numbers<[1], [0], [0], [1], [0, 0, 1, 1], [], []>, precision = #tpu.contract_precision<fp32>} : vector<8x8xf32>, vector<8x16xf32>, vector<8x16xf32> -> vector<8x16xf32>
    %c0_12 = arith.constant 0 : index
    %c0_13 = arith.constant 0 : index
    %12 = vector.load %arg6[%c0_12, %c0_13] : memref<1x16xf32, #tpu.memory_space<vmem>>, vector<1x16xf32>
    %13 = vector.broadcast %12 : vector<1x16xf32> to vector<8x16xf32>
    %14 = arith.addf %11, %13 : vector<8x16xf32>
    %15 = arith.negf %14 : vector<8x16xf32>
    %16 = math.exp %15 : vector<8x16xf32>
    %cst_14 = arith.constant 1.000000e+00 : f32
    %17 = vector.broadcast %cst_14 : f32 to vector<8x16xf32>
    %18 = arith.addf %17, %16 : vector<8x16xf32>
    %19 = arith.divf %17, %18 : vector<8x16xf32>
    %c0_15 = arith.constant 0 : index
    %c0_16 = arith.constant 0 : index
    %20 = vector.load %arg7[%c0_15, %c0_16] : memref<16x256xf32, #tpu.memory_space<vmem>>, vector<16x256xf32>
    %cst_17 = arith.constant dense<0.000000e+00> : vector<8x256xf32>
    %21 = tpu.matmul %19, %20, %cst_17 {dimension_numbers = #tpu.dot_dimension_numbers<[1], [0], [0], [1], [0, 0, 1, 1], [], []>, precision = #tpu.contract_precision<fp32>} : vector<8x16xf32>, vector<16x256xf32>, vector<8x256xf32> -> vector<8x256xf32>
    %22 = arith.mulf %21, %0 : vector<8x256xf32>
    %c0_18 = arith.constant 0 : index
    %c0_19 = arith.constant 0 : index
    %23 = vector.load %arg8[%c0_18, %c0_19] : memref<8x256xf32, #tpu.memory_space<vmem>>, vector<8x256xf32>
    tpu.vector_store %arg8[%c0_18, %c0_19], %22 {strides = array<i32>} : memref<8x256xf32, #tpu.memory_space<vmem>>, vector<8x256xf32>,
    return
  }
  func.func @transform_0(%arg0: i32) -> (i32, i32) {
    %c0_i32 = arith.constant 0 : i32
    %c0_i32_0 = arith.constant 0 : i32
    return %arg0, %c0_i32 : i32, i32
  }
  func.func @transform_1(%arg0: i32) -> (i32, i32) {
    %c0_i32 = arith.constant 0 : i32
    %c0_i32_0 = arith.constant 0 : i32
    %c0_i32_1 = arith.constant 0 : i32
    return %c0_i32, %c0_i32_0 : i32, i32
  }
  func.func @transform_2(%arg0: i32) -> (i32, i32) {
    %c0_i32 = arith.constant 0 : i32
    %c0_i32_0 = arith.constant 0 : i32
    %c0_i32_1 = arith.constant 0 : i32
    return %c0_i32, %c0_i32_0 : i32, i32
  }
  func.func @transform_3(%arg0: i32) -> (i32, i32) {
    %c0_i32 = arith.constant 0 : i32
    %c0_i32_0 = arith.constant 0 : i32
    %c0_i32_1 = arith.constant 0 : i32
    return %c0_i32, %c0_i32_0 : i32, i32
  }
  func.func @transform_4(%arg0: i32) -> (i32, i32) {
    %c0_i32 = arith.constant 0 : i32
    %c0_i32_0 = arith.constant 0 : i32
    %c0_i32_1 = arith.constant 0 : i32
    return %c0_i32, %c0_i32_0 : i32, i32
  }
  func.func @transform_5(%arg0: i32) -> (i32, i32) {
    %c0_i32 = arith.constant 0 : i32
    %c0_i32_0 = arith.constant 0 : i32
    %c0_i32_1 = arith.constant 0 : i32
    return %c0_i32, %c0_i32_0 : i32, i32
  }
  func.func @transform_6(%arg0: i32) -> (i32, i32) {
    %c0_i32 = arith.constant 0 : i32
    %c0_i32_0 = arith.constant 0 : i32
    %c0_i32_1 = arith.constant 0 : i32
    return %c0_i32, %c0_i32_0 : i32, i32
  }
  func.func @transform_7(%arg0: i32) -> (i32, i32) {
    %c0_i32 = arith.constant 0 : i32
    %c0_i32_0 = arith.constant 0 : i32
    return %arg0, %c0_i32 : i32, i32
  }
}

</mosaic_0001>

<bundles_post_ra>
// kernel: tpu_custom_call.1
= control target key start
LH: loop header
LB: loop body
LE: loop exit
PB: predicated region body
PF: predicated region fallthrough
CT: control target
= control target key end

     0   :  { %12 = vsyncpa [#allocation3], 0  ;;  %s4108_s0 = inlined_call_operand.vmem [shape: f32[32,256], index: 0, kind: input, shape index: {}]   ;;  %s4109_s1 = inlined_call_operand.vmem [shape: f32[256,16], index: 1, kind: input, shape index: {}]   ;;  %s4110_s2 = inlined_call_operand.vmem [shape: f32[16,8], index: 2, kind: input, shape index: {}]   ;;  %s4111_s3 = inlined_call_operand.vmem [shape: f32[1,8], index: 3, kind: input, shape index: {}]   ;;  %s4112_s4 = inlined_call_operand.vmem [shape: f32[8,16], index: 4, kind: input, shape index: {}]   ;;  %s4113_s5 = inlined_call_operand.vmem [shape: f32[1,16], index: 5, kind: input, shape index: {}]   ;;  %s4114_s6 = inlined_call_operand.vmem [shape: f32[16,256], index: 6, kind: input, shape index: {}]   ;;  %s4115_s7 = inlined_call_operand.hbm [shape: f32[32,256], index: 7, kind: output, shape index: {}]  }
   0x1   :  { %14 = vsyncpa [#allocation3 + $0x1], 0  ;;  %s3434_s24 = smov 0   ;;  %s3436_s25 = smov 0  }
   0x2   :  { %s3438_s26 = smov 0   ;;  %s3440_s27 = smov 0  }
   0x3 LB: > { %s3455_s28 = sadd.s32 4294967295, %s3388_s27   ;;  %s2686_s29 = sadd.s32 4294967294, %s3388_s27   ;;  %s3388_s27 = sphi %s3440_s27, %s4215_s27   ;;  %s3384_s26 = sphi %s3438_s26, %s4214_s26   ;;  %s3380_s25 = sphi %s3436_s25, %s4213_s25   ;;  %s3376_s24 = sphi %s3434_s24, %s4212_s24  }
   0x4   : > { %s3459_s30 = sadd.s32 1, %s3388_s27   ;;  %s179_s8 = sadd.s32 1, %s3384_s26 }
   0x5   : > { %s176_s9 = ssub.s32 %s3388_s27, %s3459_s30  ;;  %p189_p0 = scmp.ne.s32.totalorder %s3384_s26, %s3380_s25 }
   0x6   : > { %p177_p1 = scmp.eq.s32.totalorder %s176_s9, 0  ;;  %p190_p2 = scmp.eq.s32.totalorder %s3455_s28, 3 }
   0x7   : > { %p195_p3 = scmp.ne.s32.totalorder %s3380_s25, %s3376_s24  ;;  %p196_p4 = scmp.eq.s32.totalorder %s2686_s29, 3 }
   0x8   : > { %s3470_s10 = scalar_select %p177_p1, %s3384_s26, %s179_s8  }
   0x9   : > { %p3472_p5 = por %p190_p2, %p189_p0  ;;  %p3476_p6 = por %p196_p4, %p195_p3 }
   0xa   : > { %p2689_p7 = scmp.ge.s32.totalorder %s3388_s27, 1  ;;  %p240_p8 = scmp.lt.s32.totalorder %s3388_s27, 5 }
   0xc   : > { %p241_p9 = pnand %p2689_p7, %p240_p8 }
   0xe   : > { %244 = sbr.rel (%p241_p9) target bundleno = 1179 (0x49b), region = 48 }
  0x15   : > { %v295_v0 = vld [vmem:[%s4109_s1 + $0x80] sm:$0xff]  ;;  %v296_v1 = vld [vmem:[%s4109_s1 + $0x88] sm:$0xff]  ;;  %v297_v7 = vld [vmem:[%s4109_s1 + $0x90] sm:$0xff]  ;;  %p272_p10 = scmp.lt.s32.totalorder %s3455_s28, 3  ;;  %vm3391_vm0 = vmmov 0   ;;  %vm1182_vm1 = vcmask 130048  }
  0x16   : > { %v279_v2 = vld [vmem:[%s4109_s1] sm:$0xff]  ;;  %v360_v3 = vand.u32 4294901760, %v295_v0  ;;  %v363_v4 = vand.u32 4294901760, %v296_v1  ;;  %v280_v5 = vld [vmem:[%s4109_s1 + $0x8] sm:$0xff]  ;;  %v298_v8 = vld [vmem:[%s4109_s1 + $0x98] sm:$0xff]  ;;  %v366_v10 = vand.u32 4294901760, %v297_v7 }
  0x17   : > { %v312_v6 = vand.u32 4294901760, %v279_v2  ;;  %v315_v9 = vand.u32 4294901760, %v280_v5  ;;  %v369_v11 = vand.u32 4294901760, %v298_v8  ;;  %v281_v12 = vld [vmem:[%s4109_s1 + $0x10] sm:$0xff]  ;;  %v282_v13 = vld [vmem:[%s4109_s1 + $0x18] sm:$0xff]  ;;  %v299_v18 = vld [vmem:[%s4109_s1 + $0xa0] sm:$0xff] }
  0x18   : > { %v3506_v14 = vpack.c.bf16 %v363_v4, %v360_v3  ;;  %v318_v16 = vand.u32 4294901760, %v281_v12  ;;  %v321_v17 = vand.u32 4294901760, %v282_v13  ;;  %v300_v19 = vld [vmem:[%s4109_s1 + $0xa8] sm:$0xff]  ;;  %v283_v23 = vld [vmem:[%s4109_s1 + $0x20] sm:$0xff]  ;;  %v3529_v25 = vsub.f32 %v297_v7, %v366_v10  ;;  %v301_v37 = vld [vmem:[%s4109_s1 + $0xb0] sm:$0xff]  ;;  %s3706_s8 = scalar_select %p272_p10, %s3455_s28, 3 }
  0x19   : > { %v3508_v15 = vsub.f32 %v279_v2, %v312_v6  ;;  %v3516_v20 = vpack.c.bf16 %v315_v9, %v312_v6  ;;  %v3518_v21 = vsub.f32 %v280_v5, %v315_v9  ;;  %v3520_v22 = vpack.c.bf16 %v369_v11, %v366_v10  ;;  %v284_v24 = vld [vmem:[%s4109_s1 + $0x28] sm:$0xff]  ;;  %v302_v42 = vld [vmem:[%s4109_s1 + $0xb8] sm:$0xff]  ;;  %v285_v55 = vld [vmem:[%s4109_s1 + $0x30] sm:$0xff]  ;;  %s269_s16 = sand.u32 1, %s3380_s25  }
  0x1a   : > { %3016 = vmatprep.subr.bf16.mxu0 %v3506_v14  ;;  %v3531_v26 = vsub.f32 %v298_v8, %v369_v11  ;;  %v3533_v27 = vpack.c.bf16 %v321_v17, %v318_v16  ;;  %v3535_v28 = vsub.f32 %v281_v12, %v318_v16  ;;  %v372_v29 = vand.u32 4294901760, %v299_v18  ;;  %v286_v56 = vld [vmem:[%s4109_s1 + $0x38] sm:$0xff]  ;;  %v303_v5 = vld [vmem:[%s4109_s1 + $0xc0] sm:$0xff]  ;;  %v304_v6 = vld [vmem:[%s4109_s1 + $0xc8] sm:$0xff]  ;;  %s2701_s18 = sshll.u32 %s3706_s8, 4  ;;  %s2690_s17 = sshll.u32 %s269_s16, 4 }
  0x1b   : > { %3018 = vmatpush3.bf16.msra.mxu0 %v3516_v20  ;;  %v375_v30 = vand.u32 4294901760, %v300_v19  ;;  %v3538_v31 = vsub.f32 %v295_v0, %v360_v3  ;;  %v3540_v32 = vsub.f32 %v296_v1, %v363_v4  ;;  %v324_v33 = vand.u32 4294901760, %v283_v23  ;;  %v287_v11 = vld [vmem:[%s4109_s1 + $0x40] sm:$0xff]  ;;  %s276_s8 = scalar_lea.vmem %s4108_s0, %s2701_s18  ;;  %s2702_s18 = sshll.u32 %s3455_s28, 8 }
  0x1c   : > { %3020 = vmatprep.subr.bf16.mxu0 %v3520_v22  ;;  %v327_v34 = vand.u32 4294901760, %v284_v24  ;;  %v4133_v35 = vand.u32 4294901760, %v3508_v15  ;;  %v4132_v36 = vand.u32 4294901760, %v3518_v21  ;;  %v3548_v38 = vsub.f32 %v282_v13, %v321_v17  ;;  %s271_s19 = scalar_lea.vmem [#allocation2], %s2690_s17  ;;  %s4066_s23 = scalar_lea.hbm %s4115_s7, %s2702_s18 }
  0x1d   : > { %v3550_v39 = vpack.c.bf16 %v375_v30, %v372_v29  ;;  %v3552_v40 = vsub.f32 %v299_v18, %v372_v29  ;;  %v4135_v41 = vand.u32 4294901760, %v3538_v31  ;;  %v3558_v43 = vsub.f32 %v300_v19, %v375_v30  ;;  %v288_v29 = vld [vmem:[%s4109_s1 + $0x48] sm:$0xff]  ;;  %s2627_s20 = sshll.u32 %s271_s19, 4  ;;  %s2613_s28 = scalar_lea.sflag [#allocation3], %s269_s16  ;;  %s4068_s20 = int_to_ptr.vmem [resolvable:$true] %s2627_s20 }
  0x1e   : > { %v4134_v44 = vand.u32 4294901760, %v3540_v32  ;;  %v3561_v45 = vpack.c.bf16 %v327_v34, %v324_v33  ;;  %v3563_v46 = vsub.f32 %v283_v23, %v324_v33  ;;  %v427_v48 = vsub.f32 %v3508_v15, %v4133_v35  ;;  %s3326_s29 = scalar_lea.vmem %s4068_s20, 256 }
  0x1f   : > { %3022 = vmatpush3.bf16.msra.mxu0 %v3533_v27  ;;  %v539_v47 = vsub.f32 %v3538_v31, %v4135_v41  ;;  %v434_v49 = vsub.f32 %v3518_v21, %v4132_v36  ;;  %v378_v50 = vand.u32 4294901760, %v301_v37  ;;  %v381_v52 = vand.u32 4294901760, %v302_v42  ;;  %v3778_v41 = vld [vmem:[%s276_s8] sm:$0xff]  ;;  %p3327_p11 = scmp.ne.s32.totalorder %s4068_s20, %s3326_s29 }
  0x20   : > { %3024 = vmatprep.subr.bf16.mxu0 %v3550_v39  ;;  %v546_v51 = vsub.f32 %v3540_v32, %v4134_v44  ;;  %v4131_v53 = vand.u32 4294901760, %v3529_v25  ;;  %v4128_v54 = vand.u32 4294901760, %v3531_v26  ;;  %v3587_v58 = vsub.f32 %v284_v24, %v327_v34  ;;  %4166 = vst [vmem:[#allocation7_spill] sm:$0xff] %v3778_v41 }
  0x21   : > { %v540_v57 = vand.u32 4294901760, %v539_v47  ;;  %v428_v59 = vand.u32 4294901760, %v427_v48  ;;  %v435_v60 = vand.u32 4294901760, %v434_v49  ;;  %v3589_v62 = vpack.c.bf16 %v381_v52, %v378_v50  ;;  %p3328_p12 = pnand %p3327_p11, %p3472_p5 }
  0x22   : > { %v547_v61 = vand.u32 4294901760, %v546_v51  ;;  %v3591_v63 = vsub.f32 %v301_v37, %v378_v50  ;;  %v553_v0 = vsub.f32 %v3529_v25, %v4131_v53  ;;  %v560_v2 = vsub.f32 %v3531_v26, %v4128_v54 }
  0x23   : > { %3026 = vmatpush3.bf16.msra.mxu0 %v3561_v45  ;;  %v3049_v1 = vpack.c.bf16 %v435_v60, %v428_v59  ;;  %v330_v3 = vand.u32 4294901760, %v285_v55  ;;  %v333_v4 = vand.u32 4294901760, %v286_v56  ;;  %v4127_v9 = vand.u32 4294901760, %v3535_v28  ;;  %p3329_p13 = pneg %p3328_p12 }
  0x24   : > { %v3047_v7 = vpack.c.bf16 %v547_v61, %v540_v57  ;;  %3028 = vmatprep.subr.bf16.mxu0 %v3589_v62  ;;  %v554_v8 = vand.u32 4294901760, %v553_v0  ;;  %v4124_v10 = vand.u32 4294901760, %v3548_v38  ;;  %v3612_v12 = vsub.f32 %v302_v42, %v381_v52  ;;  %v306_v57 = vld [vmem:[%s4109_s1 + $0xd8] sm:$0xff] }
  0x25   : > { %v561_v13 = vand.u32 4294901760, %v560_v2  ;;  %v3614_v16 = vpack.c.bf16 %v333_v4, %v330_v3  ;;  %v3616_v17 = vsub.f32 %v285_v55, %v330_v3  ;;  %v441_v18 = vsub.f32 %v3535_v28, %v4127_v9 }
  0x26   : > { %3048 = vmatprep.subr.bf16.mxu1 %v3047_v7  ;;  %v448_v19 = vsub.f32 %v3548_v38, %v4124_v10  ;;  %v384_v23 = vand.u32 4294901760, %v303_v5  ;;  %v387_v24 = vand.u32 4294901760, %v304_v6  ;;  %v4123_v33 = vand.u32 4294901760, %v3552_v40 }
  0x27   : > { %3050 = vmatpush3.bf16.msra.mxu1 %v3049_v1  ;;  %v3051_v30 = vpack.c.bf16 %v561_v13, %v554_v8  ;;  %3030 = vmatpush3.bf16.msra.mxu0 %v3614_v16  ;;  %v4121_v34 = vand.u32 4294901760, %v3558_v43  ;;  %v336_v37 = vand.u32 4294901760, %v287_v11  ;;  %v3630_v42 = vsub.f32 %v286_v56, %v333_v4  ;;  %v305_v56 = vld [vmem:[%s4109_s1 + $0xd0] sm:$0xff] }
  0x28   : > { %v442_v47 = vand.u32 4294901760, %v441_v18  ;;  %v449_v48 = vand.u32 4294901760, %v448_v19  ;;  %v3632_v49 = vpack.c.bf16 %v387_v24, %v384_v23  ;;  %v3634_v50 = vsub.f32 %v303_v5, %v384_v23  ;;  %v289_v1 = vld [vmem:[%s4109_s1 + $0x50] sm:$0xff]  ;;  %v290_v18 = vld [vmem:[%s4109_s1 + $0x58] sm:$0xff] }
  0x29   : > { %3052 = vmatprep.subr.bf16.mxu1 %v3051_v30  ;;  %v567_v51 = vsub.f32 %v3552_v40, %v4123_v33  ;;  %v574_v52 = vsub.f32 %v3558_v43, %v4121_v34  ;;  %v339_v55 = vand.u32 4294901760, %v288_v29  ;;  %v3649_v60 = vsub.f32 %v304_v6, %v387_v24 }
  0x2a   : > { %v3053_v59 = vpack.c.bf16 %v449_v48, %v442_v47  ;;  %3032 = vmatprep.subr.bf16.mxu0 %v3632_v49  ;;  %v4120_v61 = vand.u32 4294901760, %v3563_v46  ;;  %v4118_v0 = vand.u32 4294901760, %v3587_v58  ;;  %v3658_v5 = vsub.f32 %v287_v11, %v336_v37 }
  0x2b   : > { %v568_v2 = vand.u32 4294901760, %v567_v51  ;;  %v575_v3 = vand.u32 4294901760, %v574_v52  ;;  %v3656_v4 = vpack.c.bf16 %v339_v55, %v336_v37  ;;  %v390_v8 = vand.u32 4294901760, %v305_v56 }
  0x2c   : > { %3054 = vmatpush3.bf16.msra.mxu1 %v3053_v59  ;;  %v455_v6 = vsub.f32 %v3563_v46, %v4120_v61  ;;  %v462_v7 = vsub.f32 %v3587_v58, %v4118_v0  ;;  %v393_v13 = vand.u32 4294901760, %v306_v57  ;;  %v4117_v11 = vand.u32 4294901760, %v3591_v63 }
  0x2d   : > { %v3055_v19 = vpack.c.bf16 %v575_v3, %v568_v2  ;;  %3034 = vmatpush3.bf16.msra.mxu0 %v3656_v4  ;;  %v4116_v23 = vand.u32 4294901760, %v3612_v12  ;;  %v342_v24 = vand.u32 4294901760, %v289_v1  ;;  %v3673_v30 = vsub.f32 %v288_v29, %v339_v55  ;;  %v307_v29 = vld [vmem:[%s4109_s1 + $0xe0] sm:$0xff]  ;;  %v308_v55 = vld [vmem:[%s4109_s1 + $0xe8] sm:$0xff] }
  0x2e   : > { %v456_v37 = vand.u32 4294901760, %v455_v6  ;;  %v463_v47 = vand.u32 4294901760, %v462_v7  ;;  %v3675_v48 = vpack.c.bf16 %v393_v13, %v390_v8  ;;  %v3677_v51 = vsub.f32 %v305_v56, %v390_v8  ;;  %v291_v8 = vld [vmem:[%s4109_s1 + $0x60] sm:$0xff] }
  0x2f   : > { %3056 = vmatprep.subr.bf16.mxu1 %v3055_v19  ;;  %v581_v52 = vsub.f32 %v3591_v63, %v4117_v11  ;;  %v588_v59 = vsub.f32 %v3612_v12, %v4116_v23  ;;  %v345_v2 = vand.u32 4294901760, %v290_v18  ;;  %v3692_v3 = vsub.f32 %v306_v57, %v393_v13 }
  0x30   : > { %v3057_v56 = vpack.c.bf16 %v463_v47, %v456_v37  ;;  %3036 = vmatprep.subr.bf16.mxu0 %v3675_v48  ;;  %v4119_v6 = vand.u32 4294901760, %v3616_v17  ;;  %v4122_v7 = vand.u32 4294901760, %v3630_v42  ;;  %v3701_v0 = vsub.f32 %v289_v1, %v342_v24 }
  0x31   : > { %v582_v19 = vand.u32 4294901760, %v581_v52  ;;  %v589_v23 = vand.u32 4294901760, %v588_v59  ;;  %v3699_v11 = vpack.c.bf16 %v345_v2, %v342_v24  ;;  %v396_v37 = vand.u32 4294901760, %v307_v29  ;;  %v292_v52 = vld [vmem:[%s4109_s1 + $0x68] sm:$0xff] }
  0x32   : > { %3058 = vmatpush3.bf16.msra.mxu1 %v3057_v56  ;;  %v469_v57 = vsub.f32 %v3616_v17, %v4119_v6  ;;  %v476_v13 = vsub.f32 %v3630_v42, %v4122_v7  ;;  %v399_v47 = vand.u32 4294901760, %v308_v55  ;;  %v4126_v24 = vand.u32 4294901760, %v3634_v50 }
  0x33   : > { %v3059_v1 = vpack.c.bf16 %v589_v23, %v582_v19  ;;  %3038 = vmatpush3.bf16.msra.mxu0 %v3699_v11  ;;  %v4125_v59 = vand.u32 4294901760, %v3649_v60  ;;  %v348_v56 = vand.u32 4294901760, %v291_v8  ;;  %v3720_v6 = vsub.f32 %v290_v18, %v345_v2  ;;  %v309_v18 = vld [vmem:[%s4109_s1 + $0xf0] sm:$0xff]  ;;  %v310_v2 = vld [vmem:[%s4109_s1 + $0xf8] sm:$0xff] }
  0x34   : > { %v470_v61 = vand.u32 4294901760, %v469_v57  ;;  %v477_v34 = vand.u32 4294901760, %v476_v13  ;;  %v3722_v7 = vpack.c.bf16 %v399_v47, %v396_v37  ;;  %v3724_v33 = vsub.f32 %v307_v29, %v396_v37 }
  0x35   : > { %3060 = vmatprep.subr.bf16.mxu1 %v3059_v1  ;;  %v595_v23 = vsub.f32 %v3634_v50, %v4126_v24  ;;  %v602_v19 = vsub.f32 %v3649_v60, %v4125_v59  ;;  %v351_v10 = vand.u32 4294901760, %v292_v52  ;;  %v3740_v57 = vsub.f32 %v308_v55, %v399_v47  ;;  %v293_v1 = vld [vmem:[%s4109_s1 + $0x70] sm:$0xff] }
  0x36   : > { %v3061_v29 = vpack.c.bf16 %v477_v34, %v470_v61  ;;  %3040 = vmatprep.subr.bf16.mxu0 %v3722_v7  ;;  %v4129_v13 = vand.u32 4294901760, %v3658_v5  ;;  %v4130_v37 = vand.u32 4294901760, %v3673_v30  ;;  %v3749_v54 = vsub.f32 %v291_v8, %v348_v56 }
  0x37   : > { %v596_v59 = vand.u32 4294901760, %v595_v23  ;;  %v603_v24 = vand.u32 4294901760, %v602_v19  ;;  %v3747_v9 = vpack.c.bf16 %v351_v10, %v348_v56  ;;  %v402_v55 = vand.u32 4294901760, %v309_v18  ;;  %v294_v23 = vld [vmem:[%s4109_s1 + $0x78] sm:$0xff] }
  0x38   : > { %3062 = vmatpush3.bf16.msra.mxu1 %v3061_v29  ;;  %v483_v34 = vsub.f32 %v3658_v5, %v4129_v13  ;;  %v490_v61 = vsub.f32 %v3673_v30, %v4130_v37  ;;  %v405_v47 = vand.u32 4294901760, %v310_v2  ;;  %v4136_v56 = vand.u32 4294901760, %v3677_v51 }
  0x39   : > { %4164 = vst [vmem:[#allocation5_spill] sm:$0xff] %v3747_v9  ;;  %v3063_v8 = vpack.c.bf16 %v603_v24, %v596_v59  ;;  %3042 = vmatpush3.bf16.msra.mxu0 %v3747_v9  ;;  %v4139_v19 = vand.u32 4294901760, %v3692_v3  ;;  %v354_v29 = vand.u32 4294901760, %v293_v1  ;;  %v3766_v13 = vsub.f32 %v292_v52, %v351_v10  ;;  %v3780_v10 = vld [vmem:[%s276_s8 + $0x8] sm:$0xff]  ;;  %s3393_s8 = smov [#allocation2]  }
  0x3a   : > { %v484_v37 = vand.u32 4294901760, %v483_v34  ;;  %v491_v53 = vand.u32 4294901760, %v490_v61  ;;  %v3768_v36 = vpack.c.bf16 %v405_v47, %v402_v55  ;;  %v3770_v35 = vsub.f32 %v309_v18, %v402_v55  ;;  %4167 = vst [vmem:[#allocation8_spill] sm:$0xff] %v3780_v10  ;;  %s3330_s9 = sshll.u32 %s3393_s8, 4  ;;  %s3331_s9 = int_to_ptr.vmem [resolvable:$false] %s3330_s9 }
  0x3b   : > { %3064 = vmatprep.subr.bf16.mxu1 %v3063_v8  ;;  %v609_v24 = vsub.f32 %v3677_v51, %v4136_v56  ;;  %v616_v59 = vsub.f32 %v3692_v3, %v4139_v19  ;;  %v357_v44 = vand.u32 4294901760, %v294_v23  ;;  %v3783_v34 = vsub.f32 %v310_v2, %v405_v47  ;;  %s3332_s13 = scalar_lea.vmem %s3331_s9, 512  ;;  %p3333_p0 = scmp.lt.s32.totalorder %s4068_s20, %s3331_s9 }
  0x3c   : > { %4165 = vst [vmem:[#allocation6_spill] sm:$0xff] %v3768_v36  ;;  %v3065_v52 = vpack.c.bf16 %v491_v53, %v484_v37  ;;  %3044 = vmatprep.subr.bf16.mxu0 %v3768_v36  ;;  %v4141_v18 = vand.u32 4294901760, %v3701_v0  ;;  %v4140_v61 = vand.u32 4294901760, %v3720_v6  ;;  %v3789_v9 = vsub.f32 %v293_v1, %v354_v29  ;;  %p3334_p1 = scmp.lt.s32.totalorder %s3332_s13, %s3326_s29 }
  0x3d   : > { %v610_v55 = vand.u32 4294901760, %v609_v24  ;;  %v617_v8 = vand.u32 4294901760, %v616_v59  ;;  %v3787_v56 = vpack.c.bf16 %v357_v44, %v354_v29  ;;  %v3798_v2 = vand.u32 4294901760, %v3780_v10 }
  0x3e   : > { %3066 = vmatpush3.bf16.msra.mxu1 %v3065_v52  ;;  %v497_v19 = vsub.f32 %v3701_v0, %v4141_v18  ;;  %v504_v53 = vsub.f32 %v3720_v6, %v4140_v61  ;;  %v3801_v37 = vand.u32 4294901760, %v3778_v41  ;;  %v4150_v1 = vand.u32 4294901760, %v3724_v33  ;;  %p3335_p2 = por %p3334_p1, %p3333_p0 }
  0x3f   : > { %4168 = vst [vmem:[#allocation9_spill] sm:$0xff] %v3787_v56  ;;  %4169 = vst [vmem:[#allocation10_spill] sm:$0xff] %v3798_v2  ;;  %v3067_v47 = vpack.c.bf16 %v617_v8, %v610_v55  ;;  %3046 = vmatpush3.bf16.msra.mxu0 %v3787_v56  ;;  %v4152_v29 = vand.u32 4294901760, %v3740_v57  ;;  %v3079_v24 = vpack.c.bf16 %v3540_v32, %v3538_v31  ;;  %648 = vmatprep.mubr.f32.mxu1 %v3798_v2  ;;  %vm1654_vm2 = vcmask 64512  }
  0x40   : > { %v498_v59 = vand.u32 4294901760, %v497_v19  ;;  %v505_v52 = vand.u32 4294901760, %v504_v53  ;;  %v3810_v61 = vsub.f32 %v3780_v10, %v3798_v2  ;;  %v3814_v18 = vsub.f32 %v3778_v41, %v3801_v37  ;;  %p3336_p3 = pnand %p3335_p2, %p3329_p13 }
  0x41   : > { %3068 = vmatprep.subr.bf16.mxu1 %v3067_v47  ;;  %v623_v55 = vsub.f32 %v3724_v33, %v4150_v1  ;;  %v630_v19 = vsub.f32 %v3740_v57, %v4152_v29  ;;  %3080 = vmatprep.subr.bf16.mxu0 %v3079_v24  ;;  %v4151_v8 = vand.u32 4294901760, %v3749_v54  ;;  %v4153_v53 = vand.u32 4294901760, %v3766_v13 }
  0x42   : > { %4170 = vst [vmem:[#allocation11_spill] sm:$0xff] %v3814_v18  ;;  %v3825_v10 = vsub.f32 %v294_v23, %v357_v44  ;;  %v3069_v41 = vpack.c.bf16 %v505_v52, %v498_v59  ;;  %v4154_v56 = vand.u32 4294901760, %v3810_v61  ;;  %v4155_v47 = vand.u32 4294901760, %v3814_v18 }
  0x43   : > { %v624_v36 = vand.u32 4294901760, %v623_v55  ;;  %v631_v2 = vand.u32 4294901760, %v630_v19  ;;  %v511_v1 = vsub.f32 %v3749_v54, %v4151_v8  ;;  %v518_v24 = vsub.f32 %v3766_v13, %v4153_v53 }
  0x44   : > { %3070 = vmatpush3.bf16.msra.mxu1 %v3069_v41  ;;  %v410_v44 = vsub.f32 %v3810_v61, %v4154_v56  ;;  %v416_v23 = vsub.f32 %v3814_v18, %v4155_v47  ;;  %v4161_v59 = vand.u32 4294901760, %v3770_v35  ;;  %v4158_v52 = vand.u32 4294901760, %v3783_v34 }
  0x45   : > { %v3071_v55 = vpack.c.bf16 %v631_v2, %v624_v36  ;;  %v512_v19 = vand.u32 4294901760, %v511_v1  ;;  %v519_v8 = vand.u32 4294901760, %v518_v24  ;;  %v3081_v29 = vpack.c.bf16 %v3518_v21, %v3508_v15 }
  0x46   : > { %v411_v53 = vand.u32 4294901760, %v410_v44  ;;  %v417_v41 = vand.u32 4294901760, %v416_v23  ;;  %v637_v56 = vsub.f32 %v3770_v35, %v4161_v59  ;;  %v644_v47 = vsub.f32 %v3783_v34, %v4158_v52 }
  0x47   : > { %3072 = vmatprep.subr.bf16.mxu1 %v3071_v55  ;;  %v3073_v18 = vpack.c.bf16 %v519_v8, %v512_v19  ;;  %v3083_v36 = vpack.c.bf16 %v3531_v26, %v3529_v25  ;;  %v4160_v2 = vand.u32 4294901760, %v3789_v9  ;;  %v4159_v1 = vand.u32 4294901760, %v3825_v10 }
  0x48   : > { %412 = vmatprep.mubr.f32.mxu0 %v411_v53  ;;  %v638_v24 = vand.u32 4294901760, %v637_v56  ;;  %v645_v44 = vand.u32 4294901760, %v644_v47  ;;  %v3085_v19 = vpack.c.bf16 %v3548_v38, %v3535_v28  ;;  %v3087_v56 = vpack.c.bf16 %v3558_v43, %v3552_v40 }
  0x49   : > { %418 = vmatmul.mubr.f32.vlgmr.msra.gmra.mrb[0].mxu0 %v417_v41  ;;  %3074 = vmatpush3.bf16.msra.mxu1 %v3073_v18  ;;  %v525_v23 = vsub.f32 %v3789_v9, %v4160_v2  ;;  %v532_v8 = vsub.f32 %v3825_v10, %v4159_v1  ;;  %v3089_v18 = vpack.c.bf16 %v3587_v58, %v3563_v46  ;;  %v4171_v41 = vand.u32 4294901760, %v3538_v31 }
  0x4a   : > { %3082 = vmatpush3.bf16.msra.mxu0 %v3081_v29  ;;  %v3075_v55 = vpack.c.bf16 %v645_v44, %v638_v24  ;;  %785 = vmatprep.mubr.f32.mxu0 %v3810_v61  ;;  %v3091_v47 = vpack.c.bf16 %v3612_v12, %v3591_v63  ;;  %v4172_v24 = vand.u32 4294901760, %v3540_v32  ;;  %v4173_v44 = vand.u32 4294901760, %v3508_v15 }
  0x4b   : > { %3084 = vmatprep.subr.bf16.mxu0 %v3083_v36  ;;  %v526_v52 = vand.u32 4294901760, %v525_v23  ;;  %v533_v53 = vand.u32 4294901760, %v532_v8  ;;  %v4174_v23 = vand.u32 4294901760, %v3518_v21  ;;  %v4175_v1 = vand.u32 4294901760, %v3529_v25 }
  0x4c   : > { %3076 = vmatprep.subr.bf16.mxu1 %v3075_v55  ;;  %v3143_v36 = vpack.c.bf16 %v4172_v24, %v4171_v41  ;;  %v4176_v55 = vand.u32 4294901760, %v3531_v26  ;;  %v4177_v59 = vand.u32 4294901760, %v3535_v28  ;;  %v4179_v31 = vand.u32 4294901760, %v3552_v40 }
  0x4d   : > { %v3077_v29 = vpack.c.bf16 %v533_v53, %v526_v52  ;;  %v3145_v8 = vpack.c.bf16 %v4174_v23, %v4173_v44  ;;  %v4178_v52 = vand.u32 4294901760, %v3548_v38  ;;  %v4180_v32 = vand.u32 4294901760, %v3558_v43  ;;  %v4195_v23 = vld [vmem:[#allocation6_spill] sm:$0xff] }
  0x4e   : > { %v3147_v2 = vpack.c.bf16 %v4176_v55, %v4175_v1  ;;  %3086 = vmatpush3.bf16.msra.mxu0 %v3085_v19  ;;  %v4181_v15 = vand.u32 4294901760, %v3563_v46  ;;  %v4182_v21 = vand.u32 4294901760, %v3587_v58  ;;  %v4183_v25 = vand.u32 4294901760, %v3591_v63  ;;  %v4196_v55 = vld [vmem:[#allocation9_spill] sm:$0xff] }
  0x4f   : > { %v3149_v53 = vpack.c.bf16 %v4178_v52, %v4177_v59  ;;  %v3151_v41 = vpack.c.bf16 %v4180_v32, %v4179_v31  ;;  %v4184_v26 = vand.u32 4294901760, %v3612_v12  ;;  %3078 = vmatpush3.bf16.msra.mxu1 %v3077_v29  ;;  %3088 = vmatprep.subr.bf16.mxu0 %v3087_v56  ;;  %v4185_v28 = vand.u32 4294901760, %v3616_v17 }
  0x50   : > { %v3153_v24 = vpack.c.bf16 %v4182_v21, %v4181_v15  ;;  %v4186_v38 = vand.u32 4294901760, %v3630_v42  ;;  %v4187_v43 = vand.u32 4294901760, %v3634_v50  ;;  %v4188_v59 = vand.u32 4294901760, %v3649_v60  ;;  %3112 = vmatprep.subr.bf16.mxu1 %v3506_v14 }
  0x51   : > { %v3155_v1 = vpack.c.bf16 %v4184_v26, %v4183_v25  ;;  %v4189_v58 = vand.u32 4294901760, %v3658_v5  ;;  %v4190_v19 = vand.u32 4294901760, %v3673_v30  ;;  %v3093_v12 = vpack.c.bf16 %v3630_v42, %v3616_v17 }
  0x52   : > { %v3157_v40 = vpack.c.bf16 %v4186_v38, %v4185_v28  ;;  %v3159_v46 = vpack.c.bf16 %v4188_v59, %v4187_v43  ;;  %650 = vmatmul.mubr.f32.vlgmr.msra.gmra.mrb[0].mxu1 %v3801_v37  ;;  %3090 = vmatpush3.bf16.msra.mxu0 %v3089_v18  ;;  %v3095_v56 = vpack.c.bf16 %v3649_v60, %v3634_v50  ;;  %v4191_v29 = vand.u32 4294901760, %v3810_v61  ;;  %v4192_v61 = vld [vmem:[#allocation11_spill] sm:$0xff]  ;;  %v4193_v18 = vld [vmem:[#allocation10_spill] sm:$0xff] }
  0x53   : > { %v3161_v63 = vpack.c.bf16 %v4190_v19, %v4189_v58  ;;  %3114 = vmatpush3.bf16.msra.mxu1 %v3516_v20  ;;  %3092 = vmatprep.subr.bf16.mxu0 %v3091_v47  ;;  %v3097_v44 = vpack.c.bf16 %v3673_v30, %v3658_v5  ;;  %v3099_v17 = vpack.c.bf16 %v3692_v3, %v3677_v51  ;;  %v4194_v47 = vld [vmem:[#allocation5_spill] sm:$0xff]  ;;  %v4200_v52 = vand.u32 4294901760, %v3701_v0 }
  0x54   : > { %3116 = vmatprep.subr.bf16.mxu1 %v3520_v22  ;;  %892 = vmatprep.mubr.f32.mxu1 %v4191_v29  ;;  %v3101_v42 = vpack.c.bf16 %v3720_v6, %v3701_v0  ;;  %v3103_v50 = vpack.c.bf16 %v3740_v57, %v3724_v33  ;;  %v3105_v60 = vpack.c.bf16 %v3766_v13, %v3749_v54  ;;  %v4206_v0 = vand.u32 4294901760, %v3770_v35 }
  0x55   : > { %v3107_v5 = vpack.c.bf16 %v3783_v34, %v3770_v35  ;;  %v3109_v30 = vpack.c.bf16 %v3825_v10, %v3789_v9  ;;  %v1173_v35 = vld [vmem:[%s4110_s2] sm:$0xff] }
  0x56   : > { %3094 = vmatpush3.bf16.msra.mxu0 %v3093_v12 }
  0x57   : > { %3118 = vmatpush3.bf16.msra.mxu1 %v3533_v27  ;;  %3096 = vmatprep.subr.bf16.mxu0 %v3095_v56 }
  0x58   : > { %3120 = vmatprep.subr.bf16.mxu1 %v3550_v39 }
  0x5a   : > { %3098 = vmatpush3.bf16.msra.mxu0 %v3097_v44 }
  0x5b   : > { %3122 = vmatpush3.bf16.msra.mxu1 %v3561_v45  ;;  %3100 = vmatprep.subr.bf16.mxu0 %v3099_v17 }
  0x5c   : > { %3124 = vmatprep.subr.bf16.mxu1 %v3589_v62 }
  0x5e   : > { %3102 = vmatpush3.bf16.msra.mxu0 %v3101_v42 }
  0x5f   : > { %3126 = vmatpush3.bf16.msra.mxu1 %v3614_v16  ;;  %3104 = vmatprep.subr.bf16.mxu0 %v3103_v50 }
  0x60   : > { %3128 = vmatprep.subr.bf16.mxu1 %v3632_v49 }
  0x62   : > { %3106 = vmatpush3.bf16.msra.mxu0 %v3105_v60 }
  0x63   : > { %3130 = vmatpush3.bf16.msra.mxu1 %v3656_v4  ;;  %3108 = vmatprep.subr.bf16.mxu0 %v3107_v5 }
  0x64   : > { %3132 = vmatprep.subr.bf16.mxu1 %v3675_v48 }
  0x66   : > { %3110 = vmatpush3.bf16.msra.mxu0 %v3109_v30 }
  0x67   : > { %3134 = vmatpush3.bf16.msra.mxu1 %v3699_v11  ;;  %3144 = vmatprep.subr.bf16.mxu0 %v3143_v36  ;;  %v4197_v36 = vand.u32 4294901760, %v4192_v61 }
  0x68   : > { %3136 = vmatprep.subr.bf16.mxu1 %v3722_v7 }
  0x69   : > { %788 = vmatmul.mubr.f32.vlgmr.msra.gmra.mrb[2].mxu0 %v4192_v61 }
  0x6a   : > { %3146 = vmatpush3.bf16.msra.mxu0 %v3145_v8  ;;  %1062 = vmatprep.mubr.f32.mxu0 %v4193_v18  ;;  %v4199_v8 = vand.u32 4294901760, %v3692_v3 }
  0x6b   : > { %3138 = vmatpush3.bf16.msra.mxu1 %v4194_v47  ;;  %3148 = vmatprep.subr.bf16.mxu0 %v3147_v2  ;;  %v4198_v2 = vand.u32 4294901760, %v3677_v51  ;;  %v4204_v51 = vand.u32 4294901760, %v3749_v54  ;;  %v1174_v54 = vld [vmem:[%s4110_s2 + $0x8] sm:$0xff] }
  0x6c   : > { %3140 = vmatprep.subr.bf16.mxu1 %v4195_v23 }
  0x6e   : > { %3150 = vmatpush3.bf16.msra.mxu0 %v3149_v53 }
  0x6f   : > { %3142 = vmatpush3.bf16.msra.mxu1 %v4196_v55  ;;  %3152 = vmatprep.subr.bf16.mxu0 %v3151_v41 }
  0x70   : > { %3176 = vmatprep.subr.bf16.mxu1 %v3506_v14  ;;  %v3163_v14 = vpack.c.bf16 %v4199_v8, %v4198_v2  ;;  %v1646_v8 = vld [vmem:[%s4112_s4] sm:$0xff] }
  0x72   : > { %896 = vmatmul.mubr.f32.vlgmr.msra.gmra.mrb[2].mxu1 %v4197_v36  ;;  %3154 = vmatpush3.bf16.msra.mxu0 %v3153_v24 }
  0x73   : > { %3178 = vmatpush3.bf16.msra.mxu1 %v3516_v20  ;;  %3156 = vmatprep.subr.bf16.mxu0 %v3155_v1  ;;  %v4201_v20 = vand.u32 4294901760, %v3720_v6 }
  0x74   : > { %3180 = vmatprep.subr.bf16.mxu1 %v3520_v22  ;;  %1166 = vmatprep.mubr.f32.mxu1 %v4193_v18  ;;  %v4202_v22 = vand.u32 4294901760, %v3724_v33  ;;  %v4208_v33 = vand.u32 4294901760, %v3789_v9  ;;  %v1187_v9 = vand.u32 4294901760, %v1173_v35 }
  0x75   : > { %v3165_v53 = vpack.c.bf16 %v4201_v20, %v4200_v52 }
  0x76   : > { %3158 = vmatpush3.bf16.msra.mxu0 %v3157_v40 }
  0x77   : > { %3182 = vmatpush3.bf16.msra.mxu1 %v3533_v27  ;;  %3160 = vmatprep.subr.bf16.mxu0 %v3159_v46  ;;  %v4203_v27 = vand.u32 4294901760, %v3740_v57 }
  0x78   : > { %3184 = vmatprep.subr.bf16.mxu1 %v3550_v39  ;;  %v4205_v39 = vand.u32 4294901760, %v3766_v13 }
  0x79   : > { %v3167_v31 = vpack.c.bf16 %v4203_v27, %v4202_v22 }
  0x7a   : > { %3162 = vmatpush3.bf16.msra.mxu0 %v3161_v63  ;;  %v3169_v3 = vpack.c.bf16 %v4205_v39, %v4204_v51 }
  0x7b   : > { %3186 = vmatpush3.bf16.msra.mxu1 %v3561_v45  ;;  %3164 = vmatprep.subr.bf16.mxu0 %v3163_v14  ;;  %v4207_v45 = vand.u32 4294901760, %v3783_v34  ;;  %v1659_v14 = vand.u32 4294901760, %v1646_v8 }
  0x7c   : > { %3188 = vmatprep.subr.bf16.mxu1 %v3589_v62  ;;  %v4209_v62 = vand.u32 4294901760, %v3825_v10 }
  0x7d   : > { %v3171_v6 = vpack.c.bf16 %v4207_v45, %v4206_v0  ;;  %v1736_v39 = vsub.f32 %v1646_v8, %v1659_v14 }
  0x7e   : > { %3166 = vmatpush3.bf16.msra.mxu0 %v3165_v53  ;;  %v3173_v57 = vpack.c.bf16 %v4209_v62, %v4208_v33  ;;  %v2693_v53 = vld [vmem:[%s4111_s3] ss:$0 sm:$0xff] }
  0x7f   : > { %3190 = vmatpush3.bf16.msra.mxu1 %v3614_v16  ;;  %3168 = vmatprep.subr.bf16.mxu0 %v3167_v31  ;;  %v1190_v16 = vand.u32 4294901760, %v1174_v54  ;;  %v1737_v45 = vand.u32 4294901760, %v1736_v39 }
  0x80   : > { %3192 = vmatprep.subr.bf16.mxu1 %v3632_v49 }
  0x81   : > { %v3208_v49 = vpack.c.bf16 %v1190_v16, %v1187_v9  ;;  %v1738_v62 = vsub.f32 %v1736_v39, %v1737_v45 }
  0x82   : > { %3170 = vmatpush3.bf16.msra.mxu0 %v3169_v3 }
  0x83   : > { %3194 = vmatpush3.bf16.msra.mxu1 %v3656_v4  ;;  %3172 = vmatprep.subr.bf16.mxu0 %v3171_v6  ;;  %v3390_v4 = vmov 0.0|0.0  }
  0x84   : > { %3196 = vmatprep.subr.bf16.mxu1 %v3675_v48  ;;  %v1272_v48 = vsub.f32 %v1174_v54, %v1190_v16  ;;  %v1739_v54 = vand.u32 4294901760, %v1738_v62  ;;  %v2111_v16 = vld [vmem:[%s4114_s6 + $0x8] sm:$0xff] }
  0x86   : > { %3174 = vmatpush3.bf16.msra.mxu0 %v3173_v57  ;;  %v1273_v10 = vand.u32 4294901760, %v1272_v48 }
  0x87   : > { %3198 = vmatpush3.bf16.msra.mxu1 %v3699_v11  ;;  %3216 = vmatprep.subr.bf16.mxu0 %v3390_v4  ;;  %v1265_v11 = vsub.f32 %v1173_v35, %v1187_v9 }
  0x88   : > { %3200 = vmatprep.subr.bf16.mxu1 %v3722_v7  ;;  %v3392_v7 = vmov 0.0  }
  0x89   : > { %1064 = vmatmul.mubr.f32.vlgmr.msra.gmra.mrb[4].mxu0 %v3801_v37  ;;  %v1266_v13 = vand.u32 4294901760, %v1265_v11  ;;  %v3214_v24 = vpack.c.bf16 %v1272_v48, %v1265_v11 }
  0x8a   : > { %3218 = vmatpush3.bf16.msra.mxu0 %v3208_v49  ;;  %2968 = vmatprep.mubr.msk.f32.mxu0 %vm3391_vm0, %v3392_v7 }
  0x8b   : > { %3202 = vmatpush3.bf16.msra.mxu1 %v4194_v47  ;;  %3219 = vmatprep.subr.bf16.mxu0 %v3390_v4  ;;  %v1267_v34 = vsub.f32 %v1265_v11, %v1266_v13  ;;  %v3220_v32 = vpack.c.bf16 %v1273_v10, %v1266_v13  ;;  %v2117_v11 = vand.u32 4294901760, %v2111_v16  ;;  %v2112_v13 = vld [vmem:[%s4114_s6 + $0x10] sm:$0xff] }
  0x8c   : > { %3204 = vmatprep.subr.bf16.mxu1 %v4195_v23 }
  0x8d   : > { %v1268_v41 = vand.u32 4294901760, %v1267_v34  ;;  %v2123_v34 = vand.u32 4294901760, %v2112_v13 }
  0x8f   : > { %3206 = vmatpush3.bf16.msra.mxu1 %v4196_v55 }
  0x90   : > { %3207 = vmatprep.subr.bf16.mxu1 %v3390_v4 }
  0x92   : > { %1168 = vmatmul.mubr.f32.vlgmr.msra.gmra.mrb[4].mxu1 %v3801_v37  ;;  %v1274_v37 = vsub.f32 %v1272_v48, %v1273_v10 }
  0x93   : > { %3209 = vmatpush3.bf16.msra.mxu1 %v3208_v49  ;;  %2947 = vmatprep.mubr.msk.f32.mxu1 %vm3391_vm0, %v3392_v7 }
  0x94   : > { %3210 = vmatprep.subr.bf16.mxu1 %v3390_v4  ;;  %v1275_v15 = vand.u32 4294901760, %v1274_v37 }
  0x96   : > { %v3211_v21 = vpack.c.bf16 %v1275_v15, %v1268_v41 }
 0x11c   : > { %v2735_v25 = vpop.f32.mrb[0].mxu0 }
 0x11d   : > { %v2736_v26 = vpop.f32.mrb[1].mxu0 }
 0x11e   : > { %v2737_v1 = vadd.f32 %v2736_v26, %v2735_v25 }
 0x125   : > { %v2770_v28 = vpop.f32.mrb[0].mxu1 }
 0x126   : > { %v2771_v38 = vpop.f32.mrb[1].mxu1 }
 0x127   : > { %v2772_v40 = vadd.f32 %v2771_v38, %v2770_v28 }
 0x129   : > { %v652_v43 = vadd.f32 %v2772_v40, %v2737_v1 }
 0x13c   : > { %v2805_v59 = vpop.f32.mrb[2].mxu0 }
 0x13d   : > { %v2806_v46 = vpop.f32.mrb[3].mxu0 }
 0x13e   : > { %v2807_v58 = vadd.f32 %v2806_v46, %v2805_v59 }
 0x140   : > { %v790_v19 = vadd.f32 %v2807_v58, %v652_v43 }
 0x145   : > { %v2840_v63 = vpop.f32.mrb[2].mxu1 }
 0x146   : > { %v2841_v12 = vpop.f32.mrb[3].mxu1 }
 0x147   : > { %v2842_v56 = vadd.f32 %v2841_v12, %v2840_v63 }
 0x149   : > { %v898_v29 = vadd.f32 %v2842_v56, %v790_v19 }
 0x15c   : > { %v2875_v44 = vpop.f32.mrb[4].mxu0 }
 0x15d   : > { %v2876_v17 = vpop.f32.mrb[5].mxu0 }
 0x15e   : > { %v2877_v42 = vadd.f32 %v2876_v17, %v2875_v44 }
 0x160   : > { %v1066_v50 = vadd.f32 %v2877_v42, %v898_v29 }
 0x165   : > { %v2910_v60 = vpop.f32.mrb[4].mxu1 }
 0x166   : > { %v2911_v5 = vpop.f32.mrb[5].mxu1 }
 0x167   : > { %v2912_v30 = vadd.f32 %v2911_v5, %v2910_v60 }
 0x169   : > { %v1170_v61 = vadd.f32 %v2912_v30, %v1066_v50  ;;  %v2694_v50 = vld [vmem:[%s4113_s5] ss:$0 sm:$0xff] }
 0x16b   : > { %v1184_v18 = vsel %vm1182_vm1, %v1170_v61, 0 }
 0x16c   : > { %v1253_v47 = vand.u32 4294901760, %v1184_v18 }
 0x16e   : > { %v1254_v23 = vsub.f32 %v1184_v18, %v1253_v47 }
 0x170   : > { %v1255_v55 = vand.u32 4294901760, %v1254_v23 }
 0x172   : > { %2969 = vmatmul.mubr.f32.vlgmr.msra.gmra.mrb[6].mxu0 %v1255_v55  ;;  %v1256_v36 = vsub.f32 %v1254_v23, %v1255_v55 }
 0x173   : > { %3221 = vmatpush3.bf16.msra.mxu0 %v3220_v32  ;;  %2975 = vmatprep.mubr.msk.f32.mxu0 %vm3391_vm0, %v3392_v7  ;;  %v2198_v32 = vsub.f32 %v2111_v16, %v2117_v11 }
 0x174   : > { %v1257_v2 = vand.u32 4294901760, %v1256_v36  ;;  %3222 = vmatprep.subr.bf16.mxu0 %v3390_v4 }
 0x175   : > { %v2199_v25 = vand.u32 4294901760, %v2198_v32 }
 0x176   : > { %2948 = vmatmul.mubr.f32.vlgmr.msra.gmra.mrb[6].mxu1 %v1257_v2 }
 0x177   : > { %3212 = vmatpush3.bf16.msra.mxu1 %v3211_v21  ;;  %2954 = vmatprep.mubr.msk.f32.mxu1 %vm3391_vm0, %v3392_v7  ;;  %v2200_v1 = vsub.f32 %v2198_v32, %v2199_v25 }
 0x178   : > { %3213 = vmatprep.subr.bf16.mxu1 %v3390_v4  ;;  %v2110_v4 = vld [vmem:[%s4114_s6] sm:$0xff] }
 0x179   : > { %v2119_v10 = vand.u32 4294901760, %v2110_v4  ;;  %v2201_v38 = vand.u32 4294901760, %v2200_v1 }
 0x17a   : > { %2976 = vmatmul.mubr.f32.vlgmr.msra.gmra.mrb[6].mxu0 %v1253_v47 }
 0x17b   : > { %3224 = vmatpush3.bf16.msra.mxu0 %v3208_v49  ;;  %2982 = vmatprep.mubr.msk.f32.mxu0 %vm3391_vm0, %v3392_v7  ;;  %v2113_v49 = vld [vmem:[%s4114_s6 + $0x18] sm:$0xff]  ;;  %v2204_v15 = vsub.f32 %v2110_v4, %v2119_v10  ;;  %v3227_v21 = vpack.c.bf16 %v2123_v34, %v2119_v10 }
 0x17c   : > { %v2121_v48 = vand.u32 4294901760, %v2113_v49 }
 0x17d   : > { %v2205_v59 = vand.u32 4294901760, %v2204_v15 }
 0x17e   : > { %2955 = vmatmul.mubr.f32.vlgmr.msra.gmra.mrb[6].mxu1 %v1253_v47  ;;  %v3225_v37 = vpack.c.bf16 %v2121_v48, %v2117_v11  ;;  %v2210_v41 = vsub.f32 %v2113_v49, %v2121_v48 }
 0x17f   : > { %3215 = vmatpush3.bf16.msra.mxu1 %v3214_v24  ;;  %2961 = vmatprep.mubr.msk.f32.mxu1 %vm3391_vm0, %v3392_v7  ;;  %v2216_v24 = vsub.f32 %v2112_v13, %v2123_v34  ;;  %v2206_v58 = vsub.f32 %v2204_v15, %v2205_v59 }
 0x180   : > { %2985 = vmatprep.subr.mxu1 %v3392_v7  ;;  %3226 = vmatprep.subr.bf16.mxu0 %v3225_v37  ;;  %v2211_v26 = vand.u32 4294901760, %v2210_v41  ;;  %v3233_v56 = vpack.c.bf16 %v2210_v41, %v2198_v32 }
 0x181   : > { %v2217_v46 = vand.u32 4294901760, %v2216_v24  ;;  %v2207_v63 = vand.u32 4294901760, %v2206_v58  ;;  %v3235_v44 = vpack.c.bf16 %v2216_v24, %v2204_v15 }
 0x182   : > { %2983 = vmatmul.mubr.f32.vlgmr.msra.gmra.mrb[6].mxu0 %v1253_v47  ;;  %v2212_v28 = vsub.f32 %v2210_v41, %v2211_v26  ;;  %v3241_v17 = vpack.c.bf16 %v2211_v26, %v2199_v25 }
 0x183   : > { %2185 = vmatprep.mubr.f32.mxu0 %v3392_v7  ;;  %3228 = vmatpush1.bf16.msra.mxu0 %v3227_v21  ;;  %v2218_v19 = vsub.f32 %v2216_v24, %v2217_v46  ;;  %v3243_v42 = vpack.c.bf16 %v2217_v46, %v2205_v59 }
 0x184   : > { %v2213_v40 = vand.u32 4294901760, %v2212_v28 }
 0x185   : > { %v2219_v12 = vand.u32 4294901760, %v2218_v19 }
 0x186   : > { %2962 = vmatmul.mubr.f32.vlgmr.msra.gmra.mrb[6].mxu1 %v1254_v23  ;;  %v3229_v43 = vpack.c.bf16 %v2213_v40, %v2201_v38 }
 0x187   : > { %2987 = vmatprep.mubr.msk.f32.mxu1 %vm3391_vm0, %v3392_v7  ;;  %2986 = vmatpush3.msra.mxu1 %v1659_v14  ;;  %v3231_v29 = vpack.c.bf16 %v2219_v12, %v2207_v63 }
 0x188   : > { %2990 = vmatprep.subr.mxu1 %v3392_v7  ;;  %3230 = vmatprep.subr.bf16.mxu0 %v3229_v43 }
 0x255   : > { %v1641_v52 = vpop.f32.mrb[6].mxu0 }
 0x256   : > { %v2984_v20 = vpop.f32.mrb[7].mxu0 }
 0x259   : > { %v1416_v22 = vpop.f32.mrb[6].mxu1 }
 0x25a   : > { %v3249_v27 = vadd.f32 %v2693_v53, %v1416_v22  ;;  %v2963_v31 = vpop.f32.mrb[7].mxu1  ;;  %v4210_v53 = vld [vmem:[#allocation7_spill] sm:$0xff] }
 0x25b   : > { %v4211_v31 = vld [vmem:[#allocation8_spill] sm:$0xff] }
 0x25c   : > { %v3250_v51 = vadd.f32 %v3249_v27, %v1641_v52 }
 0x25e   : > { %v1645_v3 = vmax.f32 %v3250_v51, 0.0 }
 0x260   : > { %v1656_v0 = vsel %vm1654_vm2, %v1645_v3, 0 }
 0x261   : > { %v1724_v6 = vand.u32 4294901760, %v1656_v0 }
 0x263   : > { %v1725_v33 = vsub.f32 %v1656_v0, %v1724_v6 }
 0x265   : > { %v1726_v57 = vand.u32 4294901760, %v1725_v33 }
 0x267   : > { %v1727_v35 = vsub.f32 %v1725_v33, %v1726_v57 }
 0x269   : > { %v1728_v9 = vand.u32 4294901760, %v1727_v35 }
 0x26b   : > { %2988 = vmatmul.mubr.f32.vlgmr.msra.gmra.mrb[8].mxu1 %v1728_v9 }
 0x26c   : > { %2991 = vmatpush3.msra.mxu1 %v1739_v54  ;;  %2992 = vmatprep.mubr.msk.f32.mxu1 %vm3391_vm0, %v3392_v7 }
 0x26d   : > { %2995 = vmatprep.subr.mxu1 %v3392_v7 }
 0x273   : > { %2993 = vmatmul.mubr.f32.vlgmr.msra.gmra.mrb[8].mxu1 %v1724_v6 }
 0x274   : > { %2996 = vmatpush3.msra.mxu1 %v1736_v39  ;;  %2997 = vmatprep.mubr.msk.f32.mxu1 %vm3391_vm0, %v3392_v7 }
 0x275   : > { %3000 = vmatprep.subr.mxu1 %v3392_v7 }
 0x27b   : > { %2998 = vmatmul.mubr.f32.vlgmr.msra.gmra.mrb[8].mxu1 %v1725_v33 }
 0x27c   : > { %3001 = vmatpush3.msra.mxu1 %v1659_v14  ;;  %3002 = vmatprep.mubr.msk.f32.mxu1 %vm3391_vm0, %v3392_v7 }
 0x27d   : > { %3005 = vmatprep.subr.mxu1 %v3392_v7 }
 0x283   : > { %3003 = vmatmul.mubr.f32.vlgmr.msra.gmra.mrb[8].mxu1 %v1726_v57 }
 0x284   : > { %3006 = vmatpush3.msra.mxu1 %v1737_v45  ;;  %3007 = vmatprep.mubr.msk.f32.mxu1 %vm3391_vm0, %v3392_v7 }
 0x285   : > { %3010 = vmatprep.subr.mxu1 %v3392_v7 }
 0x28b   : > { %3008 = vmatmul.mubr.f32.vlgmr.msra.gmra.mrb[8].mxu1 %v1724_v6 }
 0x28c   : > { %3011 = vmatpush3.msra.mxu1 %v1659_v14  ;;  %3012 = vmatprep.mubr.msk.f32.mxu1 %vm3391_vm0, %v3392_v7 }
 0x293   : > { %3013 = vmatmul.mubr.f32.vlgmr.msra.gmra.mrb[8].mxu1 %v1724_v6 }
 0x366   : > { %v2100_v60 = vpop.f32.mrb[8].mxu1 }
 0x367   : > { %v3251_v5 = vadd.f32 %v2694_v50, %v2100_v60  ;;  %v3014_v30 = vpop.f32.mrb[9].mxu1 }
 0x369   : > { %v2695_v61 = vmul.f32 -1.442695, %v3251_v5 }
 0x36b   : > { %3322 = vpow2.f32 %v2695_v61 }
 0x375   : > { %v3323_v18 = vpop.eup %3322 }
 0x376   : > { %v2107_v47 = vadd.f32 1.0, %v3323_v18 }
 0x378   : > { %3324 = vrcp.f32 %v2107_v47 }
 0x382   : > { %v3325_v23 = vpop.eup %3324 }
 0x383   : > { %v2115_v55 = vsel %vm1182_vm1, %v3325_v23, 0 }
 0x384   : > { %v2186_v36 = vand.u32 4294901760, %v2115_v55 }
 0x386   : > { %v2187_v2 = vsub.f32 %v2115_v55, %v2186_v36 }
 0x388   : > { %v2188_v8 = vand.u32 4294901760, %v2187_v2 }
 0x38a   : > { %v2189_v14 = vsub.f32 %v2187_v2, %v2188_v8 }
 0x38c   : > { %v2190_v52 = vand.u32 4294901760, %v2189_v14 }
 0x38e   : > { %2191 = vmatmul.mubr.f32.vlgmr.msra.gmra.mrb[8].mxu0 %v2190_v52 }
 0x38f   : > { %3232 = vmatpush1.bf16.msra.mxu0 %v3231_v29  ;;  %2281 = vmatprep.mubr.f32.mxu0 %v3392_v7 }
 0x390   : > { %3234 = vmatprep.subr.bf16.mxu0 %v3233_v56 }
 0x396   : > { %2283 = vmatmul.mubr.f32.vlgmr.msra.gmra.mrb[8].mxu0 %v2186_v36 }
 0x397   : > { %3236 = vmatpush1.bf16.msra.mxu0 %v3235_v44  ;;  %2361 = vmatprep.mubr.f32.mxu0 %v3392_v7 }
 0x398   : > { %3238 = vmatprep.subr.bf16.mxu0 %v3225_v37 }
 0x39e   : > { %2364 = vmatmul.mubr.f32.vlgmr.msra.gmra.mrb[8].mxu0 %v2187_v2 }
 0x39f   : > { %3240 = vmatpush1.bf16.msra.mxu0 %v3227_v21  ;;  %2438 = vmatprep.mubr.f32.mxu0 %v3392_v7 }
 0x3a0   : > { %3242 = vmatprep.subr.bf16.mxu0 %v3241_v17 }
 0x3a6   : > { %2442 = vmatmul.mubr.f32.vlgmr.msra.gmra.mrb[8].mxu0 %v2188_v8 }
 0x3a7   : > { %3244 = vmatpush1.bf16.msra.mxu0 %v3243_v42  ;;  %2524 = vmatprep.mubr.f32.mxu0 %v3392_v7 }
 0x3a8   : > { %3246 = vmatprep.subr.bf16.mxu0 %v3225_v37 }
 0x3ae   : > { %2526 = vmatmul.mubr.f32.vlgmr.msra.gmra.mrb[8].mxu0 %v2186_v36 }
 0x3af   : > { %3248 = vmatpush1.bf16.msra.mxu0 %v3227_v21  ;;  %2600 = vmatprep.mubr.f32.mxu0 %v3392_v7 }
 0x3b6   : > { %2602 = vmatmul.mubr.f32.vlgmr.msra.gmra.mrb[8].mxu0 %v2186_v36 }
 0x489   : > { %v2603_v20 = vpop.f32.mrb[8].mxu0 }
 0x48a   : > { %v2608_v22 = vmul.f32 %v2603_v20, %v4210_v53  ;;  %v2605_v27 = vpop.f32.mrb[9].mxu0 }
 0x48b   : > { %v2609_v51 = vmul.f32 %v2605_v27, %v4211_v31 }
 0x48c   : > { %2610 = vst [vmem:[%s271_s19] sm:$0xff] %v2608_v22 }
 0x48d   : > { %2611 = vst [vmem:[%s271_s19 + $0x8] sm:$0xff] %v2609_v51 }
 0x48e   : > { %3339 = shalt.err (!%p3336_p3)
}
 0x48f   : > { %s3340_s14 = scalar_lea.hbm %s4066_s23, 256  ;;  %s3344_s17 = scalar_lea.hbm %s4115_s7, 1024 }
 0x490   : > { %p3341_p4 = scmp.ne.s32.totalorder %s4066_s23, %s3340_s14  ;;  %p3345_p9 = scmp.lt.u32.totalorder %s4066_s23, %s4115_s7 }
 0x491   : > { %p3346_p10 = scmp.lt.u32.totalorder %s3344_s17, %s3340_s14  ;;  %p3348_p12 = scmp.lt.u32.totalorder %s3340_s14, %s4066_s23 }
 0x492   : > { %p3342_p7 = pnand %p3341_p4, %p3472_p5 }
 0x493   : > { %p3347_p11 = por %p3346_p10, %p3345_p9 }
 0x494   : > { %p3343_p8 = pneg %p3342_p7 }
 0x495   : > { %p3349_p13 = por %p3348_p12, %p3347_p11 }
 0x497   : > { %p3350_p0 = pnand %p3349_p13, %p3343_p8 }
 0x499   : > { %3353 = shalt.err (!%p3350_p0)
}
 0x49a   : > { %3280 = dma.vmem_to_hbm [thread:$0]  (%p3472_p5), %s4068_s20, 256, %s4066_s23, %s2613_s28  }
 0x49b PF: > { %p3286_p1 = scmp.ge.s32.totalorder %s3388_s27, 2  ;;  %s2639_s21 = sand.u32 1, %s3376_s24  }
 0x49c   : > { %s2640_s22 = scalar_lea.sflag [#allocation3], %s2639_s21 }
 0x49d   : > { %p3283_p2 = pnand %p3286_p1, %p3476_p6 }
 0x49f   : > { %3371 = dma.done.wait (!%p3283_p2), %s2640_s22, 256  }
 0x4a0   : > { %3373 = vsyncadd (!%p3283_p2), %s2640_s22, 4294967040  ;;  %p17_p3 = scmp.ge.s32.totalorder %s3459_s30, 6   ;;  %s4212_s24 = smov %s3380_s25 }
 0x4a1   : > { %s4213_s25 = smov %s3384_s26  ;;  %s4214_s26 = smov %s3470_s10 }
 0x4a2   : > { %s4215_s27 = smov %s3459_s30  ;;  %19 = sbr.rel (!%p17_p3) target bundleno = 3 (0x3), region = 83 }
 0x4a9   :  { %2645 = vsyncpa [#allocation3], 1 }
 0x4aa   :  { %2647 = vsyncpa [#allocation3 + $0x1], 1 }

</bundles_post_ra>
